<compile_context>
chip_gen: v6e
topology: v6e:2x2x1
jax: 0.10.0
libtpu: 0.0.40
codegen_flags: <defaults>
</compile_context>

<pallas_src>
from functools import partial

import jax
import jax.numpy as jnp
from jax import lax
from jax.experimental import pallas as pl
from jax.experimental.pallas import tpu as pltpu


def _lstm_seq_kernel(xg_ref, whh_ref, h0_ref, c0_ref,
                     out_ref, hT_ref, cT_ref,
                     h_scr, c_scr, *, total_steps, hidden):
    """One sequence tile of the LSTM recurrence.

    xg_ref  : (T, B, 4H) VMEM  precomputed x @ W_ih^T + b (gate order i,f,o,g)
    whh_ref : (H, 4H)    VMEM  transposed recurrent weight (gate order i,f,o,g)
    h0_ref  : (B, H)     VMEM  initial hidden state
    c0_ref  : (B, H)     VMEM  initial cell state
    out_ref : (T, B, H)  VMEM  per-step hidden states for this tile
    hT_ref  : (B, H)     VMEM  final hidden state (resident across grid)
    cT_ref  : (B, H)     VMEM  final cell state   (resident across grid)
    h_scr   : (B, H) f32 VMEM  hidden-state carry across grid steps
    c_scr   : (B, H) f32 VMEM  cell-state carry across grid steps
    """
    H = hidden
    T = xg_ref.shape[0]
    ti = pl.program_id(0)

    @pl.when(ti == 0)
    def _():
        h_scr[...] = h0_ref[...]
        c_scr[...] = c0_ref[...]

    ragged = (total_steps % T) != 0  # static python bool

    def step(t, carry):
        h, c = carry
        gates = xg_ref[t] + jnp.dot(
            h.astype(whh_ref.dtype), whh_ref[...],
            preferred_element_type=jnp.float32)                 # (B, 4H) f32
        sig = jax.nn.sigmoid(gates[:, :3 * H])                  # i | f | o, one pass
        g = jnp.tanh(gates[:, 3 * H:])
        i = sig[:, :H]
        f = sig[:, H:2 * H]
        o = sig[:, 2 * H:3 * H]
        c_new = f * c + i * g
        h_new = o * jnp.tanh(c_new)
        if ragged:  # mask steps past the true sequence end (last tile only)
            valid = (ti * T + t) < total_steps
            h_new = jnp.where(valid, h_new, h)
            c_new = jnp.where(valid, c_new, c)
        out_ref[t] = h_new.astype(out_ref.dtype)
        return h_new, c_new

    # Modest unroll: LLO cross-iteration scheduling without the vreg-spill cliff.
    h_fin, c_fin = lax.fori_loop(0, T, step, (h_scr[...], c_scr[...]),
                                 unroll=min(T, 8))

    h_scr[...] = h_fin
    c_scr[...] = c_fin
    hT_ref[...] = h_fin
    cT_ref[...] = c_fin


def _permute_gates_ifgo_to_ifog(w):
    """Reorder the trailing 4H axis from PyTorch's i,f,g,o to i,f,o,g."""
    i, f, g, o = jnp.split(w, 4, axis=-1)
    return jnp.concatenate([i, f, o, g], axis=-1)


def prepare_lstm_params(w_ih, w_hh, b_ih, b_hh, param_dtype=jnp.float32):
    """One-time parameter prep (call at init, not per forward).

    Returns (wih_t (D,4H), whh_t (H,4H), b (1,4H)) in row-vector layout with
    gate columns permuted to i,f,o,g. param_dtype=bf16 is the MXU-native path
    on v6e/v7x; bias stays f32 so the precomputed gates accumulate in f32.
    """
    wih_t = _permute_gates_ifgo_to_ifog(jnp.transpose(w_ih)).astype(param_dtype)
    whh_t = _permute_gates_ifgo_to_ifog(jnp.transpose(w_hh)).astype(param_dtype)
    b = _permute_gates_ifgo_to_ifog(
        (b_ih + b_hh).reshape(1, -1)).astype(jnp.float32)
    return wih_t, whh_t, b


@partial(jax.jit, static_argnames=("seq_tile",))
def lstm_local_forward(x, wih_t, whh_t, b, h0, c0, seq_tile=512):
    """Equivalent of LSTMLocal.forward(x) starting from hidden state (h0, c0).

    Returns (out, (h_T, c_T)); the PyTorch module returns only `out` and stashes
    (h_T, c_T) in self.hidden — thread them back in for statefulness.
    """
    S, D = x.shape
    H = whh_t.shape[0]
    H4 = 4 * H
    B = 1  # module is unbatched

    # Hoisted input projection: XLA runs this (S,D)@(D,4H) matmul at full MXU
    # efficiency; kernel only streams the result.
    xg = jnp.dot(x.astype(wih_t.dtype), wih_t,
                 preferred_element_type=jnp.float32) + b          # (S, 4H) f32
    xg = xg.reshape(S, B, H4)

    h0 = h0.reshape(B, H).astype(jnp.float32)
    c0 = c0.reshape(B, H).astype(jnp.float32)

    T = min(int(seq_tile), S)
    grid = (pl.cdiv(S, T),)

    kernel = partial(_lstm_seq_kernel, total_steps=S, hidden=H)

    out, hT, cT = pl.pallas_call(
        kernel,
        out_shape=(
            jax.ShapeDtypeStruct((S, B, H), x.dtype),
            jax.ShapeDtypeStruct((B, H), jnp.float32),
            jax.ShapeDtypeStruct((B, H), jnp.float32),
        ),
        grid_spec=pltpu.PrefetchScalarGridSpec(
            num_scalar_prefetch=0,
            grid=grid,
            in_specs=[
                pl.BlockSpec((T, B, H4), lambda t: (t, 0, 0)),   # xg seq tile
                pl.BlockSpec((H, H4), lambda t: (0, 0)),         # W_hh^T (resident)
                pl.BlockSpec((B, H), lambda t: (0, 0)),          # h0
                pl.BlockSpec((B, H), lambda t: (0, 0)),          # c0
            ],
            out_specs=[
                pl.BlockSpec((T, B, H), lambda t: (t, 0, 0)),    # per-step hidden
                pl.BlockSpec((B, H), lambda t: (0, 0)),          # h_T
                pl.BlockSpec((B, H), lambda t: (0, 0)),          # c_T
            ],
            scratch_shapes=[
                pltpu.VMEM((B, H), jnp.float32),                 # h carry
                pltpu.VMEM((B, H), jnp.float32),                 # c carry
            ],
        ),
        compiler_params=pltpu.CompilerParams(
            dimension_semantics=("arbitrary",),                  # serial recurrence
            vmem_limit_bytes=32 * 1024 * 1024),
    )(xg, whh_t, h0, c0)

    return out.reshape(S, H), (hT, cT)


def lstm_reference(x, w_ih, w_hh, b_ih, b_hh):
    """Pure-JAX reference (mirrors torch.nn.LSTM equations, gate order i,f,g,o)."""
    H = w_hh.shape[1]

    def step(carry, x_t):
        h, c = carry
        gates = x_t @ w_ih.T + h @ w_hh.T + b_ih + b_hh
        i = jax.nn.sigmoid(gates[0 * H:1 * H])
        f = jax.nn.sigmoid(gates[1 * H:2 * H])
        g = jnp.tanh(gates[2 * H:3 * H])
        o = jax.nn.sigmoid(gates[3 * H:4 * H])
        c = f * c + i * g
        h = o * jnp.tanh(c)
        return (h, c), h

    h0 = jnp.zeros((H,), jnp.float32)
    c0 = jnp.zeros((H,), jnp.float32)
    (_, _), hs = lax.scan(step, (h0, c0), x)
    return hs


if __name__ == "__main__":
    SEQ, INPUT_SIZE, HIDDEN_SIZE = 8, 16, 32

    key = jax.random.PRNGKey(0)
    kx, kwih, kwhh, kbih, kbhh = jax.random.split(key, 5)

    # PyTorch nn.LSTM init: U(-1/sqrt(H), 1/sqrt(H)) for all params.
    bound = 1.0 / jnp.sqrt(jnp.float32(HIDDEN_SIZE))
    w_ih = jax.random.uniform(kwih, (4 * HIDDEN_SIZE, INPUT_SIZE),
                              jnp.float32, -bound, bound)
    w_hh = jax.random.uniform(kwhh, (4 * HIDDEN_SIZE, HIDDEN_SIZE),
                              jnp.float32, -bound, bound)
    b_ih = jax.random.uniform(kbih, (4 * HIDDEN_SIZE,), jnp.float32, -bound, bound)
    b_hh = jax.random.uniform(kbhh, (4 * HIDDEN_SIZE,), jnp.float32, -bound, bound)

    x = jax.random.normal(kx, (SEQ, INPUT_SIZE), jnp.float32)

    # Module's initial self.hidden = zeros(num_layers=1, hidden_size).
    h0 = jnp.zeros((1, HIDDEN_SIZE), jnp.float32)
    c0 = jnp.zeros((1, HIDDEN_SIZE), jnp.float32)

    ref = lstm_reference(x, w_ih, w_hh, b_ih, b_hh)

    # --- f32 weights (exact path; matches the f32 torch module) ---
    wih_t, whh_t, b = prepare_lstm_params(w_ih, w_hh, b_ih, b_hh)
    out, (hT, cT) = lstm_local_forward(x, wih_t, whh_t, b, h0, c0)
    jax.block_until_ready((out, hT, cT))

    assert out.shape == (SEQ, HIDDEN_SIZE)
    assert jnp.allclose(out, ref, atol=1e-5, rtol=1e-5), "mismatch vs reference"
    assert jnp.allclose(hT[0], ref[-1], atol=1e-5, rtol=1e-5)

    # --- bf16 weights (MXU-native path on v6e/v7x); state/gates stay f32 ---
    wih_b, whh_b, b_b = prepare_lstm_params(w_ih, w_hh, b_ih, b_hh,
                                            param_dtype=jnp.bfloat16)
    out_b, _ = lstm_local_forward(x, wih_b, whh_b, b_b, h0, c0)
    out_b = jax.block_until_ready(out_b)
    assert jnp.allclose(out_b, ref, atol=5e-2, rtol=5e-2), "bf16 path drifted"

    print("KERNEL_OK")
</pallas_src>

<mosaic_0001>
module attributes {stable_mosaic.version = 11 : i64} {
  func.func @_lstm_seq_kernel(%arg0: i32, %arg1: memref<8x1x128xf32, #tpu.memory_space<vmem>>, %arg2: memref<32x128xf32, #tpu.memory_space<vmem>>, %arg3: memref<1x32xf32, #tpu.memory_space<vmem>>, %arg4: memref<1x32xf32, #tpu.memory_space<vmem>>, %arg5: memref<8x1x32xf32, #tpu.memory_space<vmem>>, %arg6: memref<1x32xf32, #tpu.memory_space<vmem>>, %arg7: memref<1x32xf32, #tpu.memory_space<vmem>>, %arg8: memref<1x32xf32, #tpu.memory_space<vmem>>, %arg9: memref<1x32xf32, #tpu.memory_space<vmem>>) attributes {dimension_semantics = [#tpu.dimension_semantics<arbitrary>], iteration_bounds = array<i64: 1>, scalar_prefetch = 0 : i64, scratch_operands = 2 : i64, tpu.core_type = #tpu.core_type<tc>, window_params = [{transform_indices = @transform_0, window_bounds = array<i64: 8, 1, 128>}, {pipeline_mode = #tpu.pipeline_mode<synchronous>, transform_indices = @transform_1, window_bounds = array<i64: 32, 128>}, {pipeline_mode = #tpu.pipeline_mode<synchronous>, transform_indices = @transform_2, window_bounds = array<i64: 1, 32>}, {pipeline_mode = #tpu.pipeline_mode<synchronous>, transform_indices = @transform_3, window_bounds = array<i64: 1, 32>}, {transform_indices = @transform_4, window_bounds = array<i64: 8, 1, 32>}, {pipeline_mode = #tpu.pipeline_mode<synchronous>, transform_indices = @transform_5, window_bounds = array<i64: 1, 32>}, {pipeline_mode = #tpu.pipeline_mode<synchronous>, transform_indices = @transform_6, window_bounds = array<i64: 1, 32>}]} {
    %c0_i32 = arith.constant 0 : i32
    %0 = arith.cmpi eq, %arg0, %c0_i32 : i32
    %1 = arith.extui %0 : i1 to i32
    %c0_i32_0 = arith.constant 0 : i32
    %2 = arith.cmpi ne, %1, %c0_i32_0 : i32
    scf.if %2 {
      %c0_76 = arith.constant 0 : index
      %c0_77 = arith.constant 0 : index
      %217 = vector.load %arg3[%c0_76, %c0_77] : memref<1x32xf32, #tpu.memory_space<vmem>>, vector<1x32xf32>
      %c0_78 = arith.constant 0 : index
      %c0_79 = arith.constant 0 : index
      %218 = vector.load %arg8[%c0_78, %c0_79] : memref<1x32xf32, #tpu.memory_space<vmem>>, vector<1x32xf32>
      tpu.vector_store %arg8[%c0_78, %c0_79], %217 {strides = array<i32>} : memref<1x32xf32, #tpu.memory_space<vmem>>, vector<1x32xf32>,
      %c0_80 = arith.constant 0 : index
      %c0_81 = arith.constant 0 : index
      %219 = vector.load %arg4[%c0_80, %c0_81] : memref<1x32xf32, #tpu.memory_space<vmem>>, vector<1x32xf32>
      %c0_82 = arith.constant 0 : index
      %c0_83 = arith.constant 0 : index
      %220 = vector.load %arg9[%c0_82, %c0_83] : memref<1x32xf32, #tpu.memory_space<vmem>>, vector<1x32xf32>
      tpu.vector_store %arg9[%c0_82, %c0_83], %219 {strides = array<i32>} : memref<1x32xf32, #tpu.memory_space<vmem>>, vector<1x32xf32>,
    } else {
    }
    %c0 = arith.constant 0 : index
    %c0_1 = arith.constant 0 : index
    %3 = vector.load %arg8[%c0, %c0_1] : memref<1x32xf32, #tpu.memory_space<vmem>>, vector<1x32xf32>
    %c0_2 = arith.constant 0 : index
    %c0_3 = arith.constant 0 : index
    %4 = vector.load %arg9[%c0_2, %c0_3] : memref<1x32xf32, #tpu.memory_space<vmem>>, vector<1x32xf32>
    %c0_i32_4 = arith.constant 0 : i32
    %5 = arith.index_cast %c0_i32_4 : i32 to index
    %c0_5 = arith.constant 0 : index
    %c0_6 = arith.constant 0 : index
    %6 = vector.load %arg1[%5, %c0_5, %c0_6] : memref<8x1x128xf32, #tpu.memory_space<vmem>>, vector<1x1x128xf32>
    %7 = vector.shape_cast %6 : vector<1x1x128xf32> to vector<1x128xf32>
    %c0_7 = arith.constant 0 : index
    %c0_8 = arith.constant 0 : index
    %8 = vector.load %arg2[%c0_7, %c0_8] : memref<32x128xf32, #tpu.memory_space<vmem>>, vector<32x128xf32>
    %cst = arith.constant dense<0.000000e+00> : vector<1x128xf32>
    %9 = tpu.matmul %3, %8, %cst {dimension_numbers = #tpu.dot_dimension_numbers<[1], [0], [0], [1], [0, 0, 1, 1], [], []>} : vector<1x32xf32>, vector<32x128xf32>, vector<1x128xf32> -> vector<1x128xf32>
    %10 = arith.addf %7, %9 : vector<1x128xf32>
    %11 = vector.extract_strided_slice %10 {offsets = [0, 0], sizes = [1, 96], strides = [1, 1]} : vector<1x128xf32> to vector<1x96xf32>
    %12 = arith.negf %11 : vector<1x96xf32>
    %13 = math.exp %12 : vector<1x96xf32>
    %cst_9 = arith.constant 1.000000e+00 : f32
    %14 = vector.broadcast %cst_9 : f32 to vector<1x96xf32>
    %15 = arith.addf %14, %13 : vector<1x96xf32>
    %16 = arith.divf %14, %15 : vector<1x96xf32>
    %17 = vector.extract_strided_slice %10 {offsets = [0, 96], sizes = [1, 32], strides = [1, 1]} : vector<1x128xf32> to vector<1x32xf32>
    %18 = math.tanh %17 : vector<1x32xf32>
    %19 = vector.extract_strided_slice %16 {offsets = [0, 0], sizes = [1, 32], strides = [1, 1]} : vector<1x96xf32> to vector<1x32xf32>
    %20 = vector.extract_strided_slice %16 {offsets = [0, 32], sizes = [1, 32], strides = [1, 1]} : vector<1x96xf32> to vector<1x32xf32>
    %21 = vector.extract_strided_slice %16 {offsets = [0, 64], sizes = [1, 32], strides = [1, 1]} : vector<1x96xf32> to vector<1x32xf32>
    %22 = arith.mulf %20, %4 : vector<1x32xf32>
    %23 = arith.mulf %19, %18 : vector<1x32xf32>
    %24 = arith.addf %22, %23 : vector<1x32xf32>
    %25 = math.tanh %24 : vector<1x32xf32>
    %26 = arith.mulf %21, %25 : vector<1x32xf32>
    %27 = arith.index_cast %c0_i32_4 : i32 to index
    %c0_10 = arith.constant 0 : index
    %c0_11 = arith.constant 0 : index
    %28 = vector.load %arg5[%27, %c0_10, %c0_11] : memref<8x1x32xf32, #tpu.memory_space<vmem>>, vector<1x1x32xf32>
    %29 = vector.shape_cast %28 : vector<1x1x32xf32> to vector<1x32xf32>
    %30 = vector.shape_cast %26 : vector<1x32xf32> to vector<1x1x32xf32>
    tpu.vector_store %arg5[%27, %c0_10, %c0_11], %30 {strides = array<i32>} : memref<8x1x32xf32, #tpu.memory_space<vmem>>, vector<1x1x32xf32>,
    %c1_i32 = arith.constant 1 : i32
    %31 = arith.index_cast %c1_i32 : i32 to index
    %c0_12 = arith.constant 0 : index
    %c0_13 = arith.constant 0 : index
    %32 = vector.load %arg1[%31, %c0_12, %c0_13] : memref<8x1x128xf32, #tpu.memory_space<vmem>>, vector<1x1x128xf32>
    %33 = vector.shape_cast %32 : vector<1x1x128xf32> to vector<1x128xf32>
    %c0_14 = arith.constant 0 : index
    %c0_15 = arith.constant 0 : index
    %34 = vector.load %arg2[%c0_14, %c0_15] : memref<32x128xf32, #tpu.memory_space<vmem>>, vector<32x128xf32>
    %cst_16 = arith.constant dense<0.000000e+00> : vector<1x128xf32>
    %35 = tpu.matmul %26, %34, %cst_16 {dimension_numbers = #tpu.dot_dimension_numbers<[1], [0], [0], [1], [0, 0, 1, 1], [], []>} : vector<1x32xf32>, vector<32x128xf32>, vector<1x128xf32> -> vector<1x128xf32>
    %36 = arith.addf %33, %35 : vector<1x128xf32>
    %37 = vector.extract_strided_slice %36 {offsets = [0, 0], sizes = [1, 96], strides = [1, 1]} : vector<1x128xf32> to vector<1x96xf32>
    %38 = arith.negf %37 : vector<1x96xf32>
    %39 = math.exp %38 : vector<1x96xf32>
    %cst_17 = arith.constant 1.000000e+00 : f32
    %40 = vector.broadcast %cst_17 : f32 to vector<1x96xf32>
    %41 = arith.addf %40, %39 : vector<1x96xf32>
    %42 = arith.divf %40, %41 : vector<1x96xf32>
    %43 = vector.extract_strided_slice %36 {offsets = [0, 96], sizes = [1, 32], strides = [1, 1]} : vector<1x128xf32> to vector<1x32xf32>
    %44 = math.tanh %43 : vector<1x32xf32>
    %45 = vector.extract_strided_slice %42 {offsets = [0, 0], sizes = [1, 32], strides = [1, 1]} : vector<1x96xf32> to vector<1x32xf32>
    %46 = vector.extract_strided_slice %42 {offsets = [0, 32], sizes = [1, 32], strides = [1, 1]} : vector<1x96xf32> to vector<1x32xf32>
    %47 = vector.extract_strided_slice %42 {offsets = [0, 64], sizes = [1, 32], strides = [1, 1]} : vector<1x96xf32> to vector<1x32xf32>
    %48 = arith.mulf %46, %24 : vector<1x32xf32>
    %49 = arith.mulf %45, %44 : vector<1x32xf32>
    %50 = arith.addf %48, %49 : vector<1x32xf32>
    %51 = math.tanh %50 : vector<1x32xf32>
    %52 = arith.mulf %47, %51 : vector<1x32xf32>
    %53 = arith.index_cast %c1_i32 : i32 to index
    %c0_18 = arith.constant 0 : index
    %c0_19 = arith.constant 0 : index
    %54 = vector.load %arg5[%53, %c0_18, %c0_19] : memref<8x1x32xf32, #tpu.memory_space<vmem>>, vector<1x1x32xf32>
    %55 = vector.shape_cast %54 : vector<1x1x32xf32> to vector<1x32xf32>
    %56 = vector.shape_cast %52 : vector<1x32xf32> to vector<1x1x32xf32>
    tpu.vector_store %arg5[%53, %c0_18, %c0_19], %56 {strides = array<i32>} : memref<8x1x32xf32, #tpu.memory_space<vmem>>, vector<1x1x32xf32>,
    %c2_i32 = arith.constant 2 : i32
    %57 = arith.index_cast %c2_i32 : i32 to index
    %c0_20 = arith.constant 0 : index
    %c0_21 = arith.constant 0 : index
    %58 = vector.load %arg1[%57, %c0_20, %c0_21] : memref<8x1x128xf32, #tpu.memory_space<vmem>>, vector<1x1x128xf32>
    %59 = vector.shape_cast %58 : vector<1x1x128xf32> to vector<1x128xf32>
    %c0_22 = arith.constant 0 : index
    %c0_23 = arith.constant 0 : index
    %60 = vector.load %arg2[%c0_22, %c0_23] : memref<32x128xf32, #tpu.memory_space<vmem>>, vector<32x128xf32>
    %cst_24 = arith.constant dense<0.000000e+00> : vector<1x128xf32>
    %61 = tpu.matmul %52, %60, %cst_24 {dimension_numbers = #tpu.dot_dimension_numbers<[1], [0], [0], [1], [0, 0, 1, 1], [], []>} : vector<1x32xf32>, vector<32x128xf32>, vector<1x128xf32> -> vector<1x128xf32>
    %62 = arith.addf %59, %61 : vector<1x128xf32>
    %63 = vector.extract_strided_slice %62 {offsets = [0, 0], sizes = [1, 96], strides = [1, 1]} : vector<1x128xf32> to vector<1x96xf32>
    %64 = arith.negf %63 : vector<1x96xf32>
    %65 = math.exp %64 : vector<1x96xf32>
    %cst_25 = arith.constant 1.000000e+00 : f32
    %66 = vector.broadcast %cst_25 : f32 to vector<1x96xf32>
    %67 = arith.addf %66, %65 : vector<1x96xf32>
    %68 = arith.divf %66, %67 : vector<1x96xf32>
    %69 = vector.extract_strided_slice %62 {offsets = [0, 96], sizes = [1, 32], strides = [1, 1]} : vector<1x128xf32> to vector<1x32xf32>
    %70 = math.tanh %69 : vector<1x32xf32>
    %71 = vector.extract_strided_slice %68 {offsets = [0, 0], sizes = [1, 32], strides = [1, 1]} : vector<1x96xf32> to vector<1x32xf32>
    %72 = vector.extract_strided_slice %68 {offsets = [0, 32], sizes = [1, 32], strides = [1, 1]} : vector<1x96xf32> to vector<1x32xf32>
    %73 = vector.extract_strided_slice %68 {offsets = [0, 64], sizes = [1, 32], strides = [1, 1]} : vector<1x96xf32> to vector<1x32xf32>
    %74 = arith.mulf %72, %50 : vector<1x32xf32>
    %75 = arith.mulf %71, %70 : vector<1x32xf32>
    %76 = arith.addf %74, %75 : vector<1x32xf32>
    %77 = math.tanh %76 : vector<1x32xf32>
    %78 = arith.mulf %73, %77 : vector<1x32xf32>
    %79 = arith.index_cast %c2_i32 : i32 to index
    %c0_26 = arith.constant 0 : index
    %c0_27 = arith.constant 0 : index
    %80 = vector.load %arg5[%79, %c0_26, %c0_27] : memref<8x1x32xf32, #tpu.memory_space<vmem>>, vector<1x1x32xf32>
    %81 = vector.shape_cast %80 : vector<1x1x32xf32> to vector<1x32xf32>
    %82 = vector.shape_cast %78 : vector<1x32xf32> to vector<1x1x32xf32>
    tpu.vector_store %arg5[%79, %c0_26, %c0_27], %82 {strides = array<i32>} : memref<8x1x32xf32, #tpu.memory_space<vmem>>, vector<1x1x32xf32>,
    %c3_i32 = arith.constant 3 : i32
    %83 = arith.index_cast %c3_i32 : i32 to index
    %c0_28 = arith.constant 0 : index
    %c0_29 = arith.constant 0 : index
    %84 = vector.load %arg1[%83, %c0_28, %c0_29] : memref<8x1x128xf32, #tpu.memory_space<vmem>>, vector<1x1x128xf32>
    %85 = vector.shape_cast %84 : vector<1x1x128xf32> to vector<1x128xf32>
    %c0_30 = arith.constant 0 : index
    %c0_31 = arith.constant 0 : index
    %86 = vector.load %arg2[%c0_30, %c0_31] : memref<32x128xf32, #tpu.memory_space<vmem>>, vector<32x128xf32>
    %cst_32 = arith.constant dense<0.000000e+00> : vector<1x128xf32>
    %87 = tpu.matmul %78, %86, %cst_32 {dimension_numbers = #tpu.dot_dimension_numbers<[1], [0], [0], [1], [0, 0, 1, 1], [], []>} : vector<1x32xf32>, vector<32x128xf32>, vector<1x128xf32> -> vector<1x128xf32>
    %88 = arith.addf %85, %87 : vector<1x128xf32>
    %89 = vector.extract_strided_slice %88 {offsets = [0, 0], sizes = [1, 96], strides = [1, 1]} : vector<1x128xf32> to vector<1x96xf32>
    %90 = arith.negf %89 : vector<1x96xf32>
    %91 = math.exp %90 : vector<1x96xf32>
    %cst_33 = arith.constant 1.000000e+00 : f32
    %92 = vector.broadcast %cst_33 : f32 to vector<1x96xf32>
    %93 = arith.addf %92, %91 : vector<1x96xf32>
    %94 = arith.divf %92, %93 : vector<1x96xf32>
    %95 = vector.extract_strided_slice %88 {offsets = [0, 96], sizes = [1, 32], strides = [1, 1]} : vector<1x128xf32> to vector<1x32xf32>
    %96 = math.tanh %95 : vector<1x32xf32>
    %97 = vector.extract_strided_slice %94 {offsets = [0, 0], sizes = [1, 32], strides = [1, 1]} : vector<1x96xf32> to vector<1x32xf32>
    %98 = vector.extract_strided_slice %94 {offsets = [0, 32], sizes = [1, 32], strides = [1, 1]} : vector<1x96xf32> to vector<1x32xf32>
    %99 = vector.extract_strided_slice %94 {offsets = [0, 64], sizes = [1, 32], strides = [1, 1]} : vector<1x96xf32> to vector<1x32xf32>
    %100 = arith.mulf %98, %76 : vector<1x32xf32>
    %101 = arith.mulf %97, %96 : vector<1x32xf32>
    %102 = arith.addf %100, %101 : vector<1x32xf32>
    %103 = math.tanh %102 : vector<1x32xf32>
    %104 = arith.mulf %99, %103 : vector<1x32xf32>
    %105 = arith.index_cast %c3_i32 : i32 to index
    %c0_34 = arith.constant 0 : index
    %c0_35 = arith.constant 0 : index
    %106 = vector.load %arg5[%105, %c0_34, %c0_35] : memref<8x1x32xf32, #tpu.memory_space<vmem>>, vector<1x1x32xf32>
    %107 = vector.shape_cast %106 : vector<1x1x32xf32> to vector<1x32xf32>
    %108 = vector.shape_cast %104 : vector<1x32xf32> to vector<1x1x32xf32>
    tpu.vector_store %arg5[%105, %c0_34, %c0_35], %108 {strides = array<i32>} : memref<8x1x32xf32, #tpu.memory_space<vmem>>, vector<1x1x32xf32>,
    %c4_i32 = arith.constant 4 : i32
    %109 = arith.index_cast %c4_i32 : i32 to index
    %c0_36 = arith.constant 0 : index
    %c0_37 = arith.constant 0 : index
    %110 = vector.load %arg1[%109, %c0_36, %c0_37] : memref<8x1x128xf32, #tpu.memory_space<vmem>>, vector<1x1x128xf32>
    %111 = vector.shape_cast %110 : vector<1x1x128xf32> to vector<1x128xf32>
    %c0_38 = arith.constant 0 : index
    %c0_39 = arith.constant 0 : index
    %112 = vector.load %arg2[%c0_38, %c0_39] : memref<32x128xf32, #tpu.memory_space<vmem>>, vector<32x128xf32>
    %cst_40 = arith.constant dense<0.000000e+00> : vector<1x128xf32>
    %113 = tpu.matmul %104, %112, %cst_40 {dimension_numbers = #tpu.dot_dimension_numbers<[1], [0], [0], [1], [0, 0, 1, 1], [], []>} : vector<1x32xf32>, vector<32x128xf32>, vector<1x128xf32> -> vector<1x128xf32>
    %114 = arith.addf %111, %113 : vector<1x128xf32>
    %115 = vector.extract_strided_slice %114 {offsets = [0, 0], sizes = [1, 96], strides = [1, 1]} : vector<1x128xf32> to vector<1x96xf32>
    %116 = arith.negf %115 : vector<1x96xf32>
    %117 = math.exp %116 : vector<1x96xf32>
    %cst_41 = arith.constant 1.000000e+00 : f32
    %118 = vector.broadcast %cst_41 : f32 to vector<1x96xf32>
    %119 = arith.addf %118, %117 : vector<1x96xf32>
    %120 = arith.divf %118, %119 : vector<1x96xf32>
    %121 = vector.extract_strided_slice %114 {offsets = [0, 96], sizes = [1, 32], strides = [1, 1]} : vector<1x128xf32> to vector<1x32xf32>
    %122 = math.tanh %121 : vector<1x32xf32>
    %123 = vector.extract_strided_slice %120 {offsets = [0, 0], sizes = [1, 32], strides = [1, 1]} : vector<1x96xf32> to vector<1x32xf32>
    %124 = vector.extract_strided_slice %120 {offsets = [0, 32], sizes = [1, 32], strides = [1, 1]} : vector<1x96xf32> to vector<1x32xf32>
    %125 = vector.extract_strided_slice %120 {offsets = [0, 64], sizes = [1, 32], strides = [1, 1]} : vector<1x96xf32> to vector<1x32xf32>
    %126 = arith.mulf %124, %102 : vector<1x32xf32>
    %127 = arith.mulf %123, %122 : vector<1x32xf32>
    %128 = arith.addf %126, %127 : vector<1x32xf32>
    %129 = math.tanh %128 : vector<1x32xf32>
    %130 = arith.mulf %125, %129 : vector<1x32xf32>
    %131 = arith.index_cast %c4_i32 : i32 to index
    %c0_42 = arith.constant 0 : index
    %c0_43 = arith.constant 0 : index
    %132 = vector.load %arg5[%131, %c0_42, %c0_43] : memref<8x1x32xf32, #tpu.memory_space<vmem>>, vector<1x1x32xf32>
    %133 = vector.shape_cast %132 : vector<1x1x32xf32> to vector<1x32xf32>
    %134 = vector.shape_cast %130 : vector<1x32xf32> to vector<1x1x32xf32>
    tpu.vector_store %arg5[%131, %c0_42, %c0_43], %134 {strides = array<i32>} : memref<8x1x32xf32, #tpu.memory_space<vmem>>, vector<1x1x32xf32>,
    %c5_i32 = arith.constant 5 : i32
    %135 = arith.index_cast %c5_i32 : i32 to index
    %c0_44 = arith.constant 0 : index
    %c0_45 = arith.constant 0 : index
    %136 = vector.load %arg1[%135, %c0_44, %c0_45] : memref<8x1x128xf32, #tpu.memory_space<vmem>>, vector<1x1x128xf32>
    %137 = vector.shape_cast %136 : vector<1x1x128xf32> to vector<1x128xf32>
    %c0_46 = arith.constant 0 : index
    %c0_47 = arith.constant 0 : index
    %138 = vector.load %arg2[%c0_46, %c0_47] : memref<32x128xf32, #tpu.memory_space<vmem>>, vector<32x128xf32>
    %cst_48 = arith.constant dense<0.000000e+00> : vector<1x128xf32>
    %139 = tpu.matmul %130, %138, %cst_48 {dimension_numbers = #tpu.dot_dimension_numbers<[1], [0], [0], [1], [0, 0, 1, 1], [], []>} : vector<1x32xf32>, vector<32x128xf32>, vector<1x128xf32> -> vector<1x128xf32>
    %140 = arith.addf %137, %139 : vector<1x128xf32>
    %141 = vector.extract_strided_slice %140 {offsets = [0, 0], sizes = [1, 96], strides = [1, 1]} : vector<1x128xf32> to vector<1x96xf32>
    %142 = arith.negf %141 : vector<1x96xf32>
    %143 = math.exp %142 : vector<1x96xf32>
    %cst_49 = arith.constant 1.000000e+00 : f32
    %144 = vector.broadcast %cst_49 : f32 to vector<1x96xf32>
    %145 = arith.addf %144, %143 : vector<1x96xf32>
    %146 = arith.divf %144, %145 : vector<1x96xf32>
    %147 = vector.extract_strided_slice %140 {offsets = [0, 96], sizes = [1, 32], strides = [1, 1]} : vector<1x128xf32> to vector<1x32xf32>
    %148 = math.tanh %147 : vector<1x32xf32>
    %149 = vector.extract_strided_slice %146 {offsets = [0, 0], sizes = [1, 32], strides = [1, 1]} : vector<1x96xf32> to vector<1x32xf32>
    %150 = vector.extract_strided_slice %146 {offsets = [0, 32], sizes = [1, 32], strides = [1, 1]} : vector<1x96xf32> to vector<1x32xf32>
    %151 = vector.extract_strided_slice %146 {offsets = [0, 64], sizes = [1, 32], strides = [1, 1]} : vector<1x96xf32> to vector<1x32xf32>
    %152 = arith.mulf %150, %128 : vector<1x32xf32>
    %153 = arith.mulf %149, %148 : vector<1x32xf32>
    %154 = arith.addf %152, %153 : vector<1x32xf32>
    %155 = math.tanh %154 : vector<1x32xf32>
    %156 = arith.mulf %151, %155 : vector<1x32xf32>
    %157 = arith.index_cast %c5_i32 : i32 to index
    %c0_50 = arith.constant 0 : index
    %c0_51 = arith.constant 0 : index
    %158 = vector.load %arg5[%157, %c0_50, %c0_51] : memref<8x1x32xf32, #tpu.memory_space<vmem>>, vector<1x1x32xf32>
    %159 = vector.shape_cast %158 : vector<1x1x32xf32> to vector<1x32xf32>
    %160 = vector.shape_cast %156 : vector<1x32xf32> to vector<1x1x32xf32>
    tpu.vector_store %arg5[%157, %c0_50, %c0_51], %160 {strides = array<i32>} : memref<8x1x32xf32, #tpu.memory_space<vmem>>, vector<1x1x32xf32>,
    %c6_i32 = arith.constant 6 : i32
    %161 = arith.index_cast %c6_i32 : i32 to index
    %c0_52 = arith.constant 0 : index
    %c0_53 = arith.constant 0 : index
    %162 = vector.load %arg1[%161, %c0_52, %c0_53] : memref<8x1x128xf32, #tpu.memory_space<vmem>>, vector<1x1x128xf32>
    %163 = vector.shape_cast %162 : vector<1x1x128xf32> to vector<1x128xf32>
    %c0_54 = arith.constant 0 : index
    %c0_55 = arith.constant 0 : index
    %164 = vector.load %arg2[%c0_54, %c0_55] : memref<32x128xf32, #tpu.memory_space<vmem>>, vector<32x128xf32>
    %cst_56 = arith.constant dense<0.000000e+00> : vector<1x128xf32>
    %165 = tpu.matmul %156, %164, %cst_56 {dimension_numbers = #tpu.dot_dimension_numbers<[1], [0], [0], [1], [0, 0, 1, 1], [], []>} : vector<1x32xf32>, vector<32x128xf32>, vector<1x128xf32> -> vector<1x128xf32>
    %166 = arith.addf %163, %165 : vector<1x128xf32>
    %167 = vector.extract_strided_slice %166 {offsets = [0, 0], sizes = [1, 96], strides = [1, 1]} : vector<1x128xf32> to vector<1x96xf32>
    %168 = arith.negf %167 : vector<1x96xf32>
    %169 = math.exp %168 : vector<1x96xf32>
    %cst_57 = arith.constant 1.000000e+00 : f32
    %170 = vector.broadcast %cst_57 : f32 to vector<1x96xf32>
    %171 = arith.addf %170, %169 : vector<1x96xf32>
    %172 = arith.divf %170, %171 : vector<1x96xf32>
    %173 = vector.extract_strided_slice %166 {offsets = [0, 96], sizes = [1, 32], strides = [1, 1]} : vector<1x128xf32> to vector<1x32xf32>
    %174 = math.tanh %173 : vector<1x32xf32>
    %175 = vector.extract_strided_slice %172 {offsets = [0, 0], sizes = [1, 32], strides = [1, 1]} : vector<1x96xf32> to vector<1x32xf32>
    %176 = vector.extract_strided_slice %172 {offsets = [0, 32], sizes = [1, 32], strides = [1, 1]} : vector<1x96xf32> to vector<1x32xf32>
    %177 = vector.extract_strided_slice %172 {offsets = [0, 64], sizes = [1, 32], strides = [1, 1]} : vector<1x96xf32> to vector<1x32xf32>
    %178 = arith.mulf %176, %154 : vector<1x32xf32>
    %179 = arith.mulf %175, %174 : vector<1x32xf32>
    %180 = arith.addf %178, %179 : vector<1x32xf32>
    %181 = math.tanh %180 : vector<1x32xf32>
    %182 = arith.mulf %177, %181 : vector<1x32xf32>
    %183 = arith.index_cast %c6_i32 : i32 to index
    %c0_58 = arith.constant 0 : index
    %c0_59 = arith.constant 0 : index
    %184 = vector.load %arg5[%183, %c0_58, %c0_59] : memref<8x1x32xf32, #tpu.memory_space<vmem>>, vector<1x1x32xf32>
    %185 = vector.shape_cast %184 : vector<1x1x32xf32> to vector<1x32xf32>
    %186 = vector.shape_cast %182 : vector<1x32xf32> to vector<1x1x32xf32>
    tpu.vector_store %arg5[%183, %c0_58, %c0_59], %186 {strides = array<i32>} : memref<8x1x32xf32, #tpu.memory_space<vmem>>, vector<1x1x32xf32>,
    %c7_i32 = arith.constant 7 : i32
    %187 = arith.index_cast %c7_i32 : i32 to index
    %c0_60 = arith.constant 0 : index
    %c0_61 = arith.constant 0 : index
    %188 = vector.load %arg1[%187, %c0_60, %c0_61] : memref<8x1x128xf32, #tpu.memory_space<vmem>>, vector<1x1x128xf32>
    %189 = vector.shape_cast %188 : vector<1x1x128xf32> to vector<1x128xf32>
    %c0_62 = arith.constant 0 : index
    %c0_63 = arith.constant 0 : index
    %190 = vector.load %arg2[%c0_62, %c0_63] : memref<32x128xf32, #tpu.memory_space<vmem>>, vector<32x128xf32>
    %cst_64 = arith.constant dense<0.000000e+00> : vector<1x128xf32>
    %191 = tpu.matmul %182, %190, %cst_64 {dimension_numbers = #tpu.dot_dimension_numbers<[1], [0], [0], [1], [0, 0, 1, 1], [], []>} : vector<1x32xf32>, vector<32x128xf32>, vector<1x128xf32> -> vector<1x128xf32>
    %192 = arith.addf %189, %191 : vector<1x128xf32>
    %193 = vector.extract_strided_slice %192 {offsets = [0, 0], sizes = [1, 96], strides = [1, 1]} : vector<1x128xf32> to vector<1x96xf32>
    %194 = arith.negf %193 : vector<1x96xf32>
    %195 = math.exp %194 : vector<1x96xf32>
    %cst_65 = arith.constant 1.000000e+00 : f32
    %196 = vector.broadcast %cst_65 : f32 to vector<1x96xf32>
    %197 = arith.addf %196, %195 : vector<1x96xf32>
    %198 = arith.divf %196, %197 : vector<1x96xf32>
    %199 = vector.extract_strided_slice %192 {offsets = [0, 96], sizes = [1, 32], strides = [1, 1]} : vector<1x128xf32> to vector<1x32xf32>
    %200 = math.tanh %199 : vector<1x32xf32>
    %201 = vector.extract_strided_slice %198 {offsets = [0, 0], sizes = [1, 32], strides = [1, 1]} : vector<1x96xf32> to vector<1x32xf32>
    %202 = vector.extract_strided_slice %198 {offsets = [0, 32], sizes = [1, 32], strides = [1, 1]} : vector<1x96xf32> to vector<1x32xf32>
    %203 = vector.extract_strided_slice %198 {offsets = [0, 64], sizes = [1, 32], strides = [1, 1]} : vector<1x96xf32> to vector<1x32xf32>
    %204 = arith.mulf %202, %180 : vector<1x32xf32>
    %205 = arith.mulf %201, %200 : vector<1x32xf32>
    %206 = arith.addf %204, %205 : vector<1x32xf32>
    %207 = math.tanh %206 : vector<1x32xf32>
    %208 = arith.mulf %203, %207 : vector<1x32xf32>
    %209 = arith.index_cast %c7_i32 : i32 to index
    %c0_66 = arith.constant 0 : index
    %c0_67 = arith.constant 0 : index
    %210 = vector.load %arg5[%209, %c0_66, %c0_67] : memref<8x1x32xf32, #tpu.memory_space<vmem>>, vector<1x1x32xf32>
    %211 = vector.shape_cast %210 : vector<1x1x32xf32> to vector<1x32xf32>
    %212 = vector.shape_cast %208 : vector<1x32xf32> to vector<1x1x32xf32>
    tpu.vector_store %arg5[%209, %c0_66, %c0_67], %212 {strides = array<i32>} : memref<8x1x32xf32, #tpu.memory_space<vmem>>, vector<1x1x32xf32>,
    %c8_i32 = arith.constant 8 : i32
    %c0_68 = arith.constant 0 : index
    %c0_69 = arith.constant 0 : index
    %213 = vector.load %arg8[%c0_68, %c0_69] : memref<1x32xf32, #tpu.memory_space<vmem>>, vector<1x32xf32>
    tpu.vector_store %arg8[%c0_68, %c0_69], %208 {strides = array<i32>} : memref<1x32xf32, #tpu.memory_space<vmem>>, vector<1x32xf32>,
    %c0_70 = arith.constant 0 : index
    %c0_71 = arith.constant 0 : index
    %214 = vector.load %arg9[%c0_70, %c0_71] : memref<1x32xf32, #tpu.memory_space<vmem>>, vector<1x32xf32>
    tpu.vector_store %arg9[%c0_70, %c0_71], %206 {strides = array<i32>} : memref<1x32xf32, #tpu.memory_space<vmem>>, vector<1x32xf32>,
    %c0_72 = arith.constant 0 : index
    %c0_73 = arith.constant 0 : index
    %215 = vector.load %arg6[%c0_72, %c0_73] : memref<1x32xf32, #tpu.memory_space<vmem>>, vector<1x32xf32>
    tpu.vector_store %arg6[%c0_72, %c0_73], %208 {strides = array<i32>} : memref<1x32xf32, #tpu.memory_space<vmem>>, vector<1x32xf32>,
    %c0_74 = arith.constant 0 : index
    %c0_75 = arith.constant 0 : index
    %216 = vector.load %arg7[%c0_74, %c0_75] : memref<1x32xf32, #tpu.memory_space<vmem>>, vector<1x32xf32>
    tpu.vector_store %arg7[%c0_74, %c0_75], %206 {strides = array<i32>} : memref<1x32xf32, #tpu.memory_space<vmem>>, vector<1x32xf32>,
    return
  }
  func.func @transform_0(%arg0: i32) -> (i32, i32, i32) {
    %c0_i32 = arith.constant 0 : i32
    %c0_i32_0 = arith.constant 0 : i32
    %c0_i32_1 = arith.constant 0 : i32
    return %arg0, %c0_i32, %c0_i32_0 : i32, i32, i32
  }
  func.func @transform_1(%arg0: i32) -> (i32, i32) {
    %c0_i32 = arith.constant 0 : i32
    %c0_i32_0 = arith.constant 0 : i32
    %c0_i32_1 = arith.constant 0 : i32
    return %c0_i32, %c0_i32_0 : i32, i32
  }
  func.func @transform_2(%arg0: i32) -> (i32, i32) {
    %c0_i32 = arith.constant 0 : i32
    %c0_i32_0 = arith.constant 0 : i32
    %c0_i32_1 = arith.constant 0 : i32
    return %c0_i32, %c0_i32_0 : i32, i32
  }
  func.func @transform_3(%arg0: i32) -> (i32, i32) {
    %c0_i32 = arith.constant 0 : i32
    %c0_i32_0 = arith.constant 0 : i32
    %c0_i32_1 = arith.constant 0 : i32
    return %c0_i32, %c0_i32_0 : i32, i32
  }
  func.func @transform_4(%arg0: i32) -> (i32, i32, i32) {
    %c0_i32 = arith.constant 0 : i32
    %c0_i32_0 = arith.constant 0 : i32
    %c0_i32_1 = arith.constant 0 : i32
    return %arg0, %c0_i32, %c0_i32_0 : i32, i32, i32
  }
  func.func @transform_5(%arg0: i32) -> (i32, i32) {
    %c0_i32 = arith.constant 0 : i32
    %c0_i32_0 = arith.constant 0 : i32
    %c0_i32_1 = arith.constant 0 : i32
    return %c0_i32, %c0_i32_0 : i32, i32
  }
  func.func @transform_6(%arg0: i32) -> (i32, i32) {
    %c0_i32 = arith.constant 0 : i32
    %c0_i32_0 = arith.constant 0 : i32
    %c0_i32_1 = arith.constant 0 : i32
    return %c0_i32, %c0_i32_0 : i32, i32
  }
}

</mosaic_0001>

<bundles_post_ra>
// kernel: lstm_local_forward.1
= control target key start
LH: loop header
LB: loop body
LE: loop exit
PB: predicated region body
PF: predicated region fallthrough
CT: control target
= control target key end

     0   :  { %12 = vsyncpa [#allocation5], 0  ;;  %vm27_vm0 = vcmask 253952   ;;  %v1286_v1 = vmov 0.0   ;;  %vm1287_vm1 = vmmov 0   ;;  %s1536_s0 = inlined_call_operand.vmem [shape: f32[8,1,128], index: 0, kind: input, shape index: {}]   ;;  %s1537_s1 = inlined_call_operand.vmem [shape: f32[32,128], index: 1, kind: input, shape index: {}]   ;;  %s1538_s2 = inlined_call_operand.vmem [shape: f32[1,32], index: 2, kind: input, shape index: {}]   ;;  %s1539_s3 = inlined_call_operand.vmem [shape: f32[1,32], index: 3, kind: input, shape index: {}]   ;;  %s1540_s4 = inlined_call_operand.hbm [shape: f32[8,1,32], index: 4, kind: output, shape index: {0}]   ;;  %s1541_s5 = inlined_call_operand.hbm [shape: f32[1,32], index: 5, kind: output, shape index: {1}]   ;;  %s1542_s6 = inlined_call_operand.hbm [shape: f32[1,32], index: 6, kind: output, shape index: {2}]  }
   0x1   :  { %v1334_v0 = vld [vmem:[%s1537_s1 + $0x18] sm:$0xff]  ;;  %1060 = vmatprep.subr.mxu0 %v1286_v1  ;;  %v1340_v2 = vld [vmem:[%s1537_s1 + $0x10] sm:$0xff]  ;;  %1068 = vmatprep.mubr.msk.f32.mxu0 %vm1287_vm1, %v1286_v1  ;;  %v26_v3 = vld [vmem:[%s1538_s2] sm:$0x1] }
   0x2   :  { %1061 = vmatpush3.msra.mxu0 %v1334_v0  ;;  %28 = vst.msk [vmem:[#allocation2] sm:$0x1] %vm27_vm0, %v26_v3  ;;  %1071 = vmatprep.subr.mxu1 %v1286_v1 }
   0x3   :  { %13 = vsyncpa [#allocation7], 0  ;;  %1062 = vmatprep.subr.mxu0 %v1286_v1  ;;  %v1354_v4 = vld [vmem:[%s1537_s1 + $0x8] sm:$0xff]  ;;  %1072 = vmatpush3.msra.mxu1 %v1334_v0  ;;  %v1363_v5 = vld [vmem:[%s1537_s1] sm:$0xff]  ;;  %vm38_vm2 = vcmask 261120   ;;  %s1288_s9 = smov 32   ;;  %v142_v25 = vlaneseq }
   0x4   :  { %1063 = vmatpush3.msra.mxu0 %v1340_v2  ;;  %1073 = vmatprep.subr.mxu1 %v1286_v1  ;;  %v29_v7 = vld [vmem:[%s1539_s3] sm:$0x1]  ;;  %s1289_s3 = smov 64   ;;  %v999_v32 = vld [vmem:[%s1536_s0 + $0x1] sm:$0x1]  ;;  %s1291_s24 = smov [#allocation6]  }
   0x5   :  { %1064 = vmatprep.subr.mxu0 %v1286_v1  ;;  %1074 = vmatpush3.msra.mxu1 %v1340_v2  ;;  %30 = vst.msk [vmem:[#allocation3] sm:$0x1] %vm27_vm0, %v29_v7  ;;  %v33_v8 = vld [vmem:[%s1536_s0] sm:$0x1]  ;;  %v143_v26 = vshrl.u32 %v142_v25, 7  ;;  %s972_s25 = sshll.u32 %s1291_s24, 4  ;;  %s973_s25 = int_to_ptr.vmem [resolvable:$true] %s972_s25 }
   0x6   :  { %1065 = vmatpush3.msra.mxu0 %v1354_v4  ;;  %1075 = vmatprep.subr.mxu1 %v1286_v1  ;;  %v1002_v51 = vld [vmem:[%s1536_s0 + $0x2] sm:$0x1]  ;;  %s1292_s26 = smov [#allocation4]   ;;  %s1293_s28 = smov [#allocation8]  }
   0x7   :  { %1066 = vmatprep.subr.mxu0 %v1286_v1  ;;  %1076 = vmatpush3.msra.mxu1 %v1354_v4  ;;  %v1399_v27 = vsub.s32 0, %v143_v26  ;;  %s959_s27 = sshll.u32 %s1292_s26, 4  ;;  %s982_s2 = sshll.u32 %s1293_s28, 4  ;;  %s960_s27 = int_to_ptr.vmem [resolvable:$true] %s959_s27  ;;  %s983_s2 = int_to_ptr.vmem [resolvable:$true] %s982_s2 }
   0x8   :  { %1067 = vmatpush3.msra.mxu0 %v1363_v5  ;;  %1077 = vmatprep.subr.mxu1 %v1286_v1  ;;  %s1222_s29 = scalar_lea.vmem %s973_s25, 16  ;;  %s1226_s1 = scalar_lea.vmem %s973_s25, 32 }
   0x9   :  { %v31_v6 = vld [vmem:[#allocation2] sm:$0x1]  ;;  %1078 = vmatpush3.msra.mxu1 %v1363_v5  ;;  %1079 = vmatprep.mubr.msk.f32.mxu1 %vm1287_vm1, %v1286_v1  ;;  %p1223_p0 = scmp.ne.s32.totalorder %s973_s25, %s1222_s29  ;;  %p1227_p1 = scmp.lt.s32.totalorder %s973_s25, %s973_s25 }
   0xa   :  { %1069 = vmatmul.mubr.msk.f32.vlgmr.msra.gmra.mxu0 %vm38_vm2, %v31_v6  ;;  %1082 = vmatprep.subr.mxu0 %v1286_v1  ;;  %p1228_p2 = scmp.lt.s32.totalorder %s1226_s1, %s1222_s29 }
   0xb   :  { %1083 = vmatpush3.msra.mxu0 %v1334_v0  ;;  %1090 = vmatprep.mubr.msk.f32.mxu0 %vm1287_vm1, %v1286_v1 }
   0xc   :  { %1084 = vmatprep.subr.mxu0 %v1286_v1  ;;  %1093 = vmatprep.subr.mxu1 %v1286_v1  ;;  %v32_v13 = vld [vmem:[#allocation3] sm:$0x1]  ;;  %p1229_p3 = por %p1228_p2, %p1227_p1 }
   0xd   :  { %1085 = vmatpush3.msra.mxu0 %v1340_v2 }
   0xe   :  { %1086 = vmatprep.subr.mxu0 %v1286_v1  ;;  %p1230_p4 = pnand %p1229_p3, %p1223_p0 }
   0xf   :  { %1087 = vmatpush3.msra.mxu0 %v1354_v4 }
  0x10   :  { %1088 = vmatprep.subr.mxu0 %v1286_v1 }
  0x11   :  { %1089 = vmatpush3.msra.mxu0 %v1363_v5 }
  0x12   :  { %1104 = vmatprep.subr.mxu0 %v1286_v1 }
  0xca   :  { %v108_v9 = vpop.f32.mrf.mxu0 }
  0xcb   :  { %v112_v10 = vadd.f32 %v108_v9, %v33_v8 }
  0xcc   :  { %v1070_v11 = vpop.f32.mrf.mxu0 }
  0xcd   :  { %1158 = vtanh.f32 %v112_v10  ;;  %v998_v14 = vmul.f32 -1.442695, %v112_v10  ;;  %v1005_v11 = vld [vmem:[%s1536_s0 + $0x3] sm:$0x1] }
  0xcf   :  { %1160 = vpow2.f32 %v998_v14 }
  0xda   :  { %v1159_v12 = vpop.eup %1158 }
  0xdb   :  { %126 = vrot.lane.b32.xlu0 %v1159_v12, %s1288_s9 }
  0xdc   :  { %v1161_v15 = vpop.eup %1160 }
  0xdd   :  { %v116_v16 = vadd.f32 1.0, %v1161_v15 }
  0xdf   :  { %121 = vrot.lane.b32.xlu0 %v32_v13, %s1288_s9  ;;  %1162 = vrcp.f32 %v116_v16 }
  0xec   :  { %v1163_v17 = vpop.eup %1162 }
 0x14d   :  { %v127_v18 = vpop.permute.xlu0 %126 }
 0x14e   :  { %v129_v19 = vmul.f32 %v1163_v17, %v127_v18 }
 0x150   :  { %131 = vrot.lane.b32.xlu1 %v129_v19, %s1288_s9 }
 0x151   :  { %v122_v20 = vpop.permute.xlu0 %121 }
 0x152   :  { %v124_v21 = vmul.f32 %v1163_v17, %v122_v20 }
 0x1c2   :  { %v132_v22 = vpop.permute.xlu1 %131 }
 0x1c3   :  { %v134_v23 = vadd.f32 %v132_v22, %v124_v21 }
 0x1c5   :  { %1164 = vtanh.f32 %v134_v23 }
 0x1d2   :  { %v1165_v24 = vpop.eup %1164 }
 0x1d3   :  { %137 = vrot.lane.b32.xlu1 %v1165_v24, %s1288_s9 }
 0x245   :  { %v138_v28 = vpop.permute.xlu1 %137 }
 0x246   :  { %v140_v29 = vmul.f32 %v1163_v17, %v138_v28 }
 0x248   :  { %v145_v30 = vrot.slane %v140_v29, %v1399_v27 }
 0x24a   :  { %146 = vrot.lane.b32.xlu0 %v145_v30, %s1289_s3 }
 0x2bc   :  { %v147_v31 = vpop.permute.xlu0 %146 }
 0x2bd   :  { %150 = vst.msk [vmem:[#allocation4] sm:$0x1] %vm27_vm0, %v147_v31  ;;  %1080 = vmatmul.mubr.msk.f32.vlgmr.msra.gmra.mxu1 %vm38_vm2, %v147_v31  ;;  %v1008_v31 = vld [vmem:[%s1536_s0 + $0x4] sm:$0x1] }
 0x2be   :  { %1094 = vmatpush3.msra.mxu1 %v1334_v0  ;;  %1101 = vmatprep.mubr.msk.f32.mxu1 %vm1287_vm1, %v1286_v1 }
 0x2bf   :  { %1095 = vmatprep.subr.mxu1 %v1286_v1 }
 0x2c0   :  { %1096 = vmatpush3.msra.mxu1 %v1340_v2 }
 0x2c1   :  { %1097 = vmatprep.subr.mxu1 %v1286_v1 }
 0x2c2   :  { %1098 = vmatpush3.msra.mxu1 %v1354_v4 }
 0x2c3   :  { %1099 = vmatprep.subr.mxu1 %v1286_v1 }
 0x2c4   :  { %1100 = vmatpush3.msra.mxu1 %v1363_v5 }
 0x2c5   :  { %1115 = vmatprep.subr.mxu1 %v1286_v1 }
 0x37d   :  { %v225_v33 = vpop.f32.mrf.mxu1 }
 0x37e   :  { %v229_v34 = vadd.f32 %v999_v32, %v225_v33 }
 0x37f   :  { %v1081_v35 = vpop.f32.mrf.mxu1 }
 0x380   :  { %1166 = vtanh.f32 %v229_v34  ;;  %v1001_v37 = vmul.f32 -1.442695, %v229_v34 }
 0x382   :  { %1168 = vpow2.f32 %v1001_v37 }
 0x38d   :  { %v1167_v36 = vpop.eup %1166 }
 0x38e   :  { %239 = vrot.lane.b32.xlu1 %v1167_v36, %s1288_s9 }
 0x38f   :  { %v1169_v38 = vpop.eup %1168 }
 0x390   :  { %v233_v39 = vadd.f32 1.0, %v1169_v38 }
 0x392   :  { %1170 = vrcp.f32 %v233_v39 }
 0x39f   :  { %v1171_v40 = vpop.eup %1170 }
 0x3a0   :  { %v237_v43 = vmul.f32 %v1171_v40, %v134_v23 }
 0x400   :  { %v240_v41 = vpop.permute.xlu1 %239 }
 0x401   :  { %v242_v42 = vmul.f32 %v1171_v40, %v240_v41 }
 0x403   :  { %244 = vrot.lane.b32.xlu0 %v242_v42, %s1288_s9 }
 0x475   :  { %v245_v44 = vpop.permute.xlu0 %244 }
 0x476   :  { %v247_v45 = vadd.f32 %v245_v44, %v237_v43 }
 0x478   :  { %1172 = vtanh.f32 %v247_v45 }
 0x485   :  { %v1173_v46 = vpop.eup %1172 }
 0x486   :  { %250 = vrot.lane.b32.xlu1 %v1173_v46, %s1288_s9 }
 0x4f8   :  { %v251_v47 = vpop.permute.xlu1 %250 }
 0x4f9   :  { %v253_v48 = vmul.f32 %v1171_v40, %v251_v47 }
 0x4fb   :  { %v258_v49 = vrot.slane %v253_v48, %v1399_v27 }
 0x4fd   :  { %259 = vrot.lane.b32.xlu0 %v258_v49, %s1289_s3 }
 0x56f   :  { %v260_v50 = vpop.permute.xlu0 %259 }
 0x570   :  { %263 = vst.msk [vmem:[#allocation4 + $0x1] sm:$0x1] %vm27_vm0, %v260_v50  ;;  %1091 = vmatmul.mubr.msk.f32.vlgmr.msra.gmra.mxu0 %vm38_vm2, %v260_v50  ;;  %v1011_v50 = vld [vmem:[%s1536_s0 + $0x5] sm:$0x1] }
 0x571   :  { %1105 = vmatpush3.msra.mxu0 %v1334_v0  ;;  %1112 = vmatprep.mubr.msk.f32.mxu0 %vm1287_vm1, %v1286_v1 }
 0x572   :  { %1106 = vmatprep.subr.mxu0 %v1286_v1 }
 0x573   :  { %1107 = vmatpush3.msra.mxu0 %v1340_v2 }
 0x574   :  { %1108 = vmatprep.subr.mxu0 %v1286_v1 }
 0x575   :  { %1109 = vmatpush3.msra.mxu0 %v1354_v4 }
 0x576   :  { %1110 = vmatprep.subr.mxu0 %v1286_v1 }
 0x577   :  { %1111 = vmatpush3.msra.mxu0 %v1363_v5 }
 0x578   :  { %1126 = vmatprep.subr.mxu0 %v1286_v1 }
 0x630   :  { %v338_v52 = vpop.f32.mrf.mxu0 }
 0x631   :  { %v342_v53 = vadd.f32 %v1002_v51, %v338_v52 }
 0x632   :  { %v1092_v54 = vpop.f32.mrf.mxu0 }
 0x633   :  { %1174 = vtanh.f32 %v342_v53  ;;  %v1004_v56 = vmul.f32 -1.442695, %v342_v53 }
 0x635   :  { %1176 = vpow2.f32 %v1004_v56 }
 0x640   :  { %v1175_v55 = vpop.eup %1174 }
 0x641   :  { %352 = vrot.lane.b32.xlu1 %v1175_v55, %s1288_s9 }
 0x642   :  { %v1177_v57 = vpop.eup %1176 }
 0x643   :  { %v346_v58 = vadd.f32 1.0, %v1177_v57 }
 0x645   :  { %1178 = vrcp.f32 %v346_v58 }
 0x652   :  { %v1179_v59 = vpop.eup %1178 }
 0x653   :  { %v350_v62 = vmul.f32 %v1179_v59, %v247_v45 }
 0x6b3   :  { %v353_v60 = vpop.permute.xlu1 %352 }
 0x6b4   :  { %v355_v61 = vmul.f32 %v1179_v59, %v353_v60 }
 0x6b6   :  { %357 = vrot.lane.b32.xlu0 %v355_v61, %s1288_s9 }
 0x728   :  { %v358_v63 = vpop.permute.xlu0 %357 }
 0x729   :  { %v360_v3 = vadd.f32 %v358_v63, %v350_v62 }
 0x72b   :  { %1180 = vtanh.f32 %v360_v3 }
 0x738   :  { %v1181_v6 = vpop.eup %1180 }
 0x739   :  { %363 = vrot.lane.b32.xlu1 %v1181_v6, %s1288_s9 }
 0x7ab   :  { %v364_v7 = vpop.permute.xlu1 %363 }
 0x7ac   :  { %v366_v8 = vmul.f32 %v1179_v59, %v364_v7 }
 0x7ae   :  { %v371_v9 = vrot.slane %v366_v8, %v1399_v27 }
 0x7b0   :  { %372 = vrot.lane.b32.xlu0 %v371_v9, %s1289_s3 }
 0x822   :  { %v373_v10 = vpop.permute.xlu0 %372 }
 0x823   :  { %376 = vst.msk [vmem:[#allocation4 + $0x2] sm:$0x1] %vm27_vm0, %v373_v10  ;;  %1102 = vmatmul.mubr.msk.f32.vlgmr.msra.gmra.mxu1 %vm38_vm2, %v373_v10 }
 0x824   :  { %1116 = vmatpush3.msra.mxu1 %v1334_v0  ;;  %1123 = vmatprep.mubr.msk.f32.mxu1 %vm1287_vm1, %v1286_v1 }
 0x825   :  { %1117 = vmatprep.subr.mxu1 %v1286_v1 }
 0x826   :  { %1118 = vmatpush3.msra.mxu1 %v1340_v2 }
 0x827   :  { %1119 = vmatprep.subr.mxu1 %v1286_v1 }
 0x828   :  { %1120 = vmatpush3.msra.mxu1 %v1354_v4 }
 0x829   :  { %1121 = vmatprep.subr.mxu1 %v1286_v1 }
 0x82a   :  { %1122 = vmatpush3.msra.mxu1 %v1363_v5 }
 0x82b   :  { %1137 = vmatprep.subr.mxu1 %v1286_v1 }
 0x8e3   :  { %v451_v12 = vpop.f32.mrf.mxu1 }
 0x8e4   :  { %v455_v13 = vadd.f32 %v1005_v11, %v451_v12 }
 0x8e5   :  { %v1103_v14 = vpop.f32.mrf.mxu1 }
 0x8e6   :  { %1182 = vtanh.f32 %v455_v13  ;;  %v1007_v16 = vmul.f32 -1.442695, %v455_v13 }
 0x8e8   :  { %1184 = vpow2.f32 %v1007_v16 }
 0x8f3   :  { %v1183_v15 = vpop.eup %1182 }
 0x8f4   :  { %465 = vrot.lane.b32.xlu1 %v1183_v15, %s1288_s9 }
 0x8f5   :  { %v1185_v17 = vpop.eup %1184 }
 0x8f6   :  { %v459_v18 = vadd.f32 1.0, %v1185_v17 }
 0x8f8   :  { %1186 = vrcp.f32 %v459_v18 }
 0x905   :  { %v1187_v19 = vpop.eup %1186 }
 0x906   :  { %v463_v22 = vmul.f32 %v1187_v19, %v360_v3  ;;  %v1014_v3 = vld [vmem:[%s1536_s0 + $0x6] sm:$0x1] }
 0x966   :  { %v466_v20 = vpop.permute.xlu1 %465 }
 0x967   :  { %v468_v21 = vmul.f32 %v1187_v19, %v466_v20 }
 0x969   :  { %470 = vrot.lane.b32.xlu0 %v468_v21, %s1288_s9 }
 0x9db   :  { %v471_v23 = vpop.permute.xlu0 %470 }
 0x9dc   :  { %v473_v24 = vadd.f32 %v471_v23, %v463_v22 }
 0x9de   :  { %1188 = vtanh.f32 %v473_v24 }
 0x9eb   :  { %v1189_v25 = vpop.eup %1188 }
 0x9ec   :  { %476 = vrot.lane.b32.xlu1 %v1189_v25, %s1288_s9 }
 0xa5e   :  { %v477_v26 = vpop.permute.xlu1 %476 }
 0xa5f   :  { %v479_v28 = vmul.f32 %v1187_v19, %v477_v26 }
 0xa61   :  { %v484_v29 = vrot.slane %v479_v28, %v1399_v27 }
 0xa63   :  { %485 = vrot.lane.b32.xlu0 %v484_v29, %s1289_s3 }
 0xad5   :  { %v486_v30 = vpop.permute.xlu0 %485 }
 0xad6   :  { %489 = vst.msk [vmem:[#allocation4 + $0x3] sm:$0x1] %vm27_vm0, %v486_v30  ;;  %1113 = vmatmul.mubr.msk.f32.vlgmr.msra.gmra.mxu0 %vm38_vm2, %v486_v30 }
 0xad7   :  { %1127 = vmatpush3.msra.mxu0 %v1334_v0  ;;  %1134 = vmatprep.mubr.msk.f32.mxu0 %vm1287_vm1, %v1286_v1 }
 0xad8   :  { %1128 = vmatprep.subr.mxu0 %v1286_v1 }
 0xad9   :  { %1129 = vmatpush3.msra.mxu0 %v1340_v2 }
 0xada   :  { %1130 = vmatprep.subr.mxu0 %v1286_v1 }
 0xadb   :  { %1131 = vmatpush3.msra.mxu0 %v1354_v4 }
 0xadc   :  { %1132 = vmatprep.subr.mxu0 %v1286_v1 }
 0xadd   :  { %1133 = vmatpush3.msra.mxu0 %v1363_v5 }
 0xb96   :  { %v564_v32 = vpop.f32.mrf.mxu0 }
 0xb97   :  { %v568_v33 = vadd.f32 %v1008_v31, %v564_v32 }
 0xb98   :  { %v1114_v34 = vpop.f32.mrf.mxu0 }
 0xb99   :  { %1190 = vtanh.f32 %v568_v33  ;;  %v1010_v36 = vmul.f32 -1.442695, %v568_v33 }
 0xb9b   :  { %1192 = vpow2.f32 %v1010_v36 }
 0xba6   :  { %v1191_v35 = vpop.eup %1190 }
 0xba7   :  { %578 = vrot.lane.b32.xlu1 %v1191_v35, %s1288_s9 }
 0xba8   :  { %v1193_v37 = vpop.eup %1192 }
 0xba9   :  { %v572_v38 = vadd.f32 1.0, %v1193_v37 }
 0xbab   :  { %1194 = vrcp.f32 %v572_v38 }
 0xbb8   :  { %v1195_v39 = vpop.eup %1194 }
 0xbb9   :  { %v576_v42 = vmul.f32 %v1195_v39, %v473_v24  ;;  %v1017_v24 = vld [vmem:[%s1536_s0 + $0x7] sm:$0x1]  ;;  %s1290_s0 = smov 96  }
 0xc19   :  { %v579_v40 = vpop.permute.xlu1 %578 }
 0xc1a   :  { %v581_v41 = vmul.f32 %v1195_v39, %v579_v40 }
 0xc1c   :  { %583 = vrot.lane.b32.xlu0 %v581_v41, %s1288_s9 }
 0xc8e   :  { %v584_v43 = vpop.permute.xlu0 %583 }
 0xc8f   :  { %v586_v44 = vadd.f32 %v584_v43, %v576_v42 }
 0xc91   :  { %1196 = vtanh.f32 %v586_v44 }
 0xc9e   :  { %v1197_v45 = vpop.eup %1196 }
 0xc9f   :  { %589 = vrot.lane.b32.xlu1 %v1197_v45, %s1288_s9 }
 0xd11   :  { %v590_v46 = vpop.permute.xlu1 %589 }
 0xd12   :  { %v592_v47 = vmul.f32 %v1195_v39, %v590_v46 }
 0xd14   :  { %v597_v48 = vrot.slane %v592_v47, %v1399_v27 }
 0xd16   :  { %598 = vrot.lane.b32.xlu0 %v597_v48, %s1289_s3 }
 0xd88   :  { %v599_v49 = vpop.permute.xlu0 %598 }
 0xd89   :  { %602 = vst.msk [vmem:[#allocation4 + $0x4] sm:$0x1] %vm27_vm0, %v599_v49  ;;  %1124 = vmatmul.mubr.msk.f32.vlgmr.msra.gmra.mxu1 %vm38_vm2, %v599_v49 }
 0xd8a   :  { %1138 = vmatpush3.msra.mxu1 %v1334_v0  ;;  %1145 = vmatprep.mubr.msk.f32.mxu1 %vm1287_vm1, %v1286_v1 }
 0xd8b   :  { %1139 = vmatprep.subr.mxu1 %v1286_v1 }
 0xd8c   :  { %1140 = vmatpush3.msra.mxu1 %v1340_v2 }
 0xd8d   :  { %1141 = vmatprep.subr.mxu1 %v1286_v1 }
 0xd8e   :  { %1142 = vmatpush3.msra.mxu1 %v1354_v4 }
 0xd8f   :  { %1143 = vmatprep.subr.mxu1 %v1286_v1 }
 0xd90   :  { %1144 = vmatpush3.msra.mxu1 %v1363_v5 }
 0xe49   :  { %v677_v0 = vpop.f32.mrf.mxu1 }
 0xe4a   :  { %v681_v51 = vadd.f32 %v1011_v50, %v677_v0 }
 0xe4b   :  { %v1125_v52 = vpop.f32.mrf.mxu1 }
 0xe4c   :  { %1198 = vtanh.f32 %v681_v51  ;;  %v1013_v2 = vmul.f32 -1.442695, %v681_v51 }
 0xe4e   :  { %1200 = vpow2.f32 %v1013_v2 }
 0xe59   :  { %v1199_v53 = vpop.eup %1198 }
 0xe5a   :  { %691 = vrot.lane.b32.xlu1 %v1199_v53, %s1288_s9 }
 0xe5b   :  { %v1201_v54 = vpop.eup %1200 }
 0xe5c   :  { %v685_v55 = vadd.f32 1.0, %v1201_v54 }
 0xe5e   :  { %1202 = vrcp.f32 %v685_v55 }
 0xe6b   :  { %v1203_v4 = vpop.eup %1202 }
 0xe6c   :  { %v689_v5 = vmul.f32 %v1203_v4, %v586_v44 }
 0xecc   :  { %v692_v1 = vpop.permute.xlu1 %691 }
 0xecd   :  { %v694_v56 = vmul.f32 %v1203_v4, %v692_v1 }
 0xecf   :  { %696 = vrot.lane.b32.xlu0 %v694_v56, %s1288_s9 }
 0xf41   :  { %v697_v57 = vpop.permute.xlu0 %696 }
 0xf42   :  { %v699_v58 = vadd.f32 %v697_v57, %v689_v5 }
 0xf44   :  { %1204 = vtanh.f32 %v699_v58 }
 0xf51   :  { %v1205_v59 = vpop.eup %1204 }
 0xf52   :  { %702 = vrot.lane.b32.xlu1 %v1205_v59, %s1288_s9 }
 0xfc4   :  { %v703_v60 = vpop.permute.xlu1 %702 }
 0xfc5   :  { %v705_v61 = vmul.f32 %v1203_v4, %v703_v60 }
 0xfc7   :  { %v710_v62 = vrot.slane %v705_v61, %v1399_v27 }
 0xfc9   :  { %711 = vrot.lane.b32.xlu0 %v710_v62, %s1289_s3 }
0x103b   :  { %v712_v63 = vpop.permute.xlu0 %711 }
0x103c   :  { %715 = vst.msk [vmem:[#allocation4 + $0x5] sm:$0x1] %vm27_vm0, %v712_v63  ;;  %1135 = vmatmul.mubr.msk.f32.vlgmr.msra.gmra.mxu0 %vm38_vm2, %v712_v63 }
0x10fc   :  { %v790_v6 = vpop.f32.mrf.mxu0 }
0x10fd   :  { %v794_v7 = vadd.f32 %v1014_v3, %v790_v6 }
0x10fe   :  { %v1136_v8 = vpop.f32.mrf.mxu0 }
0x10ff   :  { %1206 = vtanh.f32 %v794_v7  ;;  %v1016_v10 = vmul.f32 -1.442695, %v794_v7 }
0x1101   :  { %1208 = vpow2.f32 %v1016_v10 }
0x110c   :  { %v1207_v9 = vpop.eup %1206 }
0x110d   :  { %804 = vrot.lane.b32.xlu1 %v1207_v9, %s1288_s9 }
0x110e   :  { %v1209_v11 = vpop.eup %1208 }
0x110f   :  { %v798_v12 = vadd.f32 1.0, %v1209_v11 }
0x1111   :  { %1210 = vrcp.f32 %v798_v12 }
0x111e   :  { %v1211_v13 = vpop.eup %1210 }
0x111f   :  { %v802_v16 = vmul.f32 %v1211_v13, %v699_v58 }
0x117f   :  { %v805_v14 = vpop.permute.xlu1 %804 }
0x1180   :  { %v807_v15 = vmul.f32 %v1211_v13, %v805_v14 }
0x1182   :  { %809 = vrot.lane.b32.xlu0 %v807_v15, %s1288_s9 }
0x11f4   :  { %v810_v17 = vpop.permute.xlu0 %809 }
0x11f5   :  { %v812_v18 = vadd.f32 %v810_v17, %v802_v16 }
0x11f7   :  { %1212 = vtanh.f32 %v812_v18 }
0x1204   :  { %v1213_v19 = vpop.eup %1212 }
0x1205   :  { %815 = vrot.lane.b32.xlu1 %v1213_v19, %s1288_s9 }
0x1277   :  { %v816_v20 = vpop.permute.xlu1 %815 }
0x1278   :  { %v818_v21 = vmul.f32 %v1211_v13, %v816_v20 }
0x127a   :  { %v823_v22 = vrot.slane %v818_v21, %v1399_v27 }
0x127c   :  { %824 = vrot.lane.b32.xlu0 %v823_v22, %s1289_s3 }
0x12ee   :  { %v825_v23 = vpop.permute.xlu0 %824 }
0x12ef   :  { %828 = vst.msk [vmem:[#allocation4 + $0x6] sm:$0x1] %vm27_vm0, %v825_v23  ;;  %1146 = vmatmul.mubr.msk.f32.vlgmr.msra.gmra.mxu1 %vm38_vm2, %v825_v23 }
0x13af   :  { %v903_v25 = vpop.f32.mrf.mxu1 }
0x13b0   :  { %v907_v26 = vadd.f32 %v1017_v24, %v903_v25 }
0x13b1   :  { %v1147_v28 = vpop.f32.mrf.mxu1 }
0x13b2   :  { %1214 = vtanh.f32 %v907_v26  ;;  %v1019_v30 = vmul.f32 -1.442695, %v907_v26 }
0x13b4   :  { %1216 = vpow2.f32 %v1019_v30 }
0x13bf   :  { %v1215_v29 = vpop.eup %1214 }
0x13c0   :  { %917 = vrot.lane.b32.xlu1 %v1215_v29, %s1288_s9 }
0x13c1   :  { %v1217_v31 = vpop.eup %1216 }
0x13c2   :  { %v911_v32 = vadd.f32 1.0, %v1217_v31 }
0x13c4   :  { %1218 = vrcp.f32 %v911_v32 }
0x13d1   :  { %v1219_v33 = vpop.eup %1218 }
0x13d2   :  { %v915_v36 = vmul.f32 %v1219_v33, %v812_v18 }
0x1432   :  { %v918_v34 = vpop.permute.xlu1 %917 }
0x1433   :  { %v920_v35 = vmul.f32 %v1219_v33, %v918_v34 }
0x1435   :  { %922 = vrot.lane.b32.xlu0 %v920_v35, %s1288_s9 }
0x14a7   :  { %v923_v37 = vpop.permute.xlu0 %922 }
0x14a8   :  { %v925_v38 = vadd.f32 %v923_v37, %v915_v36 }
0x14aa   :  { %1220 = vtanh.f32 %v925_v38  ;;  %v947_v40 = vrot.slane %v925_v38, %v1399_v27 }
0x14b7   :  { %v1221_v39 = vpop.eup %1220 }
0x14b8   :  { %928 = vrot.lane.b32.xlu1 %v1221_v39, %s1288_s9 }
0x14bc   :  { %948 = vrot.lane.b32.xlu1 %v947_v40, %s1290_s0 }
0x152a   :  { %v929_v41 = vpop.permute.xlu1 %928 }
0x152b   :  { %v931_v42 = vmul.f32 %v1219_v33, %v929_v41 }
0x152d   :  { %v936_v43 = vrot.slane %v931_v42, %v1399_v27 }
0x152e   :  { %v949_v44 = vpop.permute.xlu1 %948 }
0x152f   :  { %951 = vst.msk [vmem:[#allocation3] sm:$0x1] %vm27_vm0, %v949_v44  ;;  %953 = vst.msk [vmem:[#allocation8] sm:$0x1] %vm27_vm0, %v949_v44  ;;  %937 = vrot.lane.b32.xlu0 %v936_v43, %s1289_s3 }
0x15a1   :  { %v938_v45 = vpop.permute.xlu0 %937 }
0x15a2   :  { %941 = vst.msk [vmem:[#allocation4 + $0x7] sm:$0x1] %vm27_vm0, %v938_v45  ;;  %942 = vst.msk [vmem:[#allocation2] sm:$0x1] %vm27_vm0, %v938_v45 }
0x15a3   :  { %952 = vst.msk [vmem:[#allocation6] sm:$0x1] %vm27_vm0, %v938_v45 }
0x15a4   :  { %1233 = shalt.err (!%p1230_p4)
}
0x15a5   :  { %975 = dma.vmem_to_hbm [thread:$0]  %s973_s25, 16, %s1541_s5, [#allocation7]  }
0x15a6   :  { %s1242_s8 = scalar_lea.vmem %s960_s27, 128  ;;  %p1247_p6 = scmp.lt.s32.totalorder %s960_s27, %s960_s27 }
0x15a7   :  { %p1243_p5 = scmp.ne.s32.totalorder %s960_s27, %s1242_s8  ;;  %p1248_p7 = scmp.lt.s32.totalorder %s1242_s8, %s1242_s8 }
0x15a9   :  { %p1249_p8 = por %p1248_p7, %p1247_p6 }
0x15ab   :  { %p1250_p9 = pnand %p1249_p8, %p1243_p5 }
0x15ad   :  { %1253 = shalt.err (!%p1250_p9)
}
0x15ae   :  { %s1294_s9 = smov 16   ;;  %s1295_s3 = smov 1  }
0x15af   :  { %965 = dma.vmem_to_hbm [thread:$0]  %s960_s27, 128, %s1540_s4, [#allocation5], %s1294_s9, %s1294_s9, %s1295_s3  }
0x15b0   :  { %s1262_s12 = scalar_lea.vmem %s983_s2, 16  ;;  %s1266_s13 = scalar_lea.vmem %s983_s2, 32 }
0x15b1   :  { %p1263_p10 = scmp.ne.s32.totalorder %s983_s2, %s1262_s12  ;;  %p1267_p11 = scmp.lt.s32.totalorder %s983_s2, %s983_s2 }
0x15b2   :  { %p1268_p12 = scmp.lt.s32.totalorder %s1266_s13, %s1262_s12 }
0x15b4   :  { %p1269_p13 = por %p1268_p12, %p1267_p11 }
0x15b6   :  { %p1270_p0 = pnand %p1269_p13, %p1263_p10 }
0x15b8   :  { %1273 = shalt.err (!%p1270_p0)
}
0x15b9   :  { %985 = dma.vmem_to_hbm [thread:$0]  %s983_s2, 16, %s1542_s6, [#allocation7]  }
0x15ba   :  { %1282 = dma.done.wait [#allocation5], 128  }
0x15bb   :  { %1283 = vsyncadd [#allocation5], 4294967168 }
0x15bc   :  { %1284 = dma.done.wait [#allocation7], 32  }
0x15bd   :  { %1285 = vsyncadd [#allocation7], 4294967264 }
0x15be   :  { %995 = vsyncpa [#allocation5], 1 }
0x15bf   :  { %996 = vsyncpa [#allocation7], 1 }

</bundles_post_ra>
